<compile_context>
chip_gen: v7x
topology: tpu7x:2x2x1
jax: 0.10.0
libtpu: 0.0.40
codegen_flags: <defaults>
</compile_context>

<pallas_src>
import functools

import numpy as np
import jax
import jax.numpy as jnp
from jax.experimental import pallas as pl
from jax.experimental.pallas import tpu as pltpu


# --------------------------------------------------------------------------- #
# Kernel
# --------------------------------------------------------------------------- #
def _ffnn_kernel(scale_zp_ref, x_ref, *args, num_layers):
    """Fused quantized FFNN forward.

    scale_zp_ref : (2,)             f32 in SMEM: [x_scale, x_zp]
    x_ref        : (B, Din0)        bf16, quint8 integer repr (0..255)
    args[:L]     : (Din_l, Dout_l)  bf16, qint8 integer weights (pre-transposed)
    args[L]      : (1, Dout_0)      f32, rowsum(W0) (exact integers)
    args[L + 1]  : (B, Dout_pad)    bf16 output, quint8 integer repr
    """
    w_refs = args[:num_layers]
    rowsum0_ref = args[num_layers]
    o_ref = args[num_layers + 1]

    x_scale = scale_zp_ref[0]
    x_zp = scale_zp_ref[1]

    h = x_ref[...]  # bf16 integer values
    q = None
    for li in range(num_layers):
        # Integer-domain matmul: bf16 inputs are exact for 8-bit integers,
        # f32 accumulation is exact (|acc| << 2^24 at these sizes).
        acc = jnp.dot(h, w_refs[li][...], preferred_element_type=jnp.float32)
        if li == 0:
            # Fold the input dequant: x_scale * (x @ W0.T - zp * rowsum(W0))
            acc = x_scale * (acc - x_zp * rowsum0_ref[...])
        # Requantize: out_scale == 1.0, out_zp == 0 for every layer -> round +
        # clamp to the quint8 range.  The following quantized ReLU (clamp at
        # zero_point == 0) is a provable no-op and is skipped.
        q = jnp.clip(jnp.round(acc), 0.0, 255.0)
        if li < num_layers - 1:
            h = q.astype(jnp.bfloat16)  # exact: integers in [0, 255]
    o_ref[...] = q.astype(o_ref.dtype)  # bf16 exact for 0..255


# --------------------------------------------------------------------------- #
# One-time parameter preparation (cache this; do NOT redo per call)
# --------------------------------------------------------------------------- #
def prepare_ffnn_qint8_params(params):
    """Transpose/pad/cast the qint8 weights once and precompute rowsum(W0).

    params : list of (W_int, bias); W_int (Dout, Din) carries qint8 integers.
             bias is ignored (the module forces bias = zeros).
    Returns (prepared_pytree, out_dim).
    """
    num_layers = len(params)
    w_ts = []
    for li, (w, _b) in enumerate(params):
        wt = jnp.asarray(w, jnp.float32).T                 # (Din, Dout)
        if li == num_layers - 1:
            pad = (-wt.shape[1]) % 128                     # lane-dense final store
            if pad:
                wt = jnp.pad(wt, ((0, 0), (0, pad)))
        w_ts.append(jax.device_put(wt.astype(jnp.bfloat16)))
    # rowsum(W0) for the zero-point correction (exact integers in f32).
    rowsum0 = jnp.sum(jnp.asarray(params[0][0], jnp.float32), axis=1).reshape(1, -1)
    prepared = {"w_ts": tuple(w_ts), "rowsum0": jax.device_put(rowsum0)}
    out_dim = int(params[-1][0].shape[0])
    return prepared, out_dim


# --------------------------------------------------------------------------- #
# Jitted forward: one pallas_call, then a static slice to drop lane padding.
# --------------------------------------------------------------------------- #
@functools.partial(jax.jit, static_argnames=("out_dim",))
def ffnn_qint8_forward(x_q, prepared, scale_zp, *, out_dim):
    """x_q: (B, Din) float array carrying quint8 integer values 0..255.
    prepared: output of prepare_ffnn_qint8_params.
    scale_zp: (2,) f32 array [x_scale, x_zp] (runtime SMEM scalars)."""
    w_ts = prepared["w_ts"]
    rowsum0 = prepared["rowsum0"]
    num_layers = len(w_ts)
    B = x_q.shape[0]
    padded_out = w_ts[-1].shape[1]

    x_bf16 = x_q.astype(jnp.bfloat16)  # 0..255 integers, exact in bf16

    kernel = functools.partial(_ffnn_kernel, num_layers=num_layers)

    in_specs = [pl.BlockSpec(memory_space=pltpu.MemorySpace.SMEM)]          # scale_zp
    in_specs.append(pl.BlockSpec(x_bf16.shape, lambda *_: (0, 0)))          # x
    for wt in w_ts:                                                         # weights
        in_specs.append(pl.BlockSpec(wt.shape, lambda *_: (0, 0)))
    in_specs.append(pl.BlockSpec(rowsum0.shape, lambda *_: (0, 0)))         # rowsum(W0)

    out = pl.pallas_call(
        kernel,
        out_shape=jax.ShapeDtypeStruct((B, padded_out), jnp.bfloat16),
        grid=(1,),
        in_specs=in_specs,
        out_specs=pl.BlockSpec((B, padded_out), lambda *_: (0, 0)),
        compiler_params=pltpu.CompilerParams(
            dimension_semantics=("arbitrary",)),
    )(scale_zp, x_bf16, *w_ts, rowsum0)

    return out[:, :out_dim]


# --------------------------------------------------------------------------- #
# Exact numpy reference
# --------------------------------------------------------------------------- #
def _reference_forward_np(x_q, params, *, x_scale, x_zp):
    """Exact numpy reference (integer-domain matmul, f32 scaling/rounding)."""
    h = np.asarray(x_q, dtype=np.float64)  # quint8 integer repr
    q = None
    for li, (w, _b) in enumerate(params):
        wf = np.asarray(w, dtype=np.float64)
        acc = h @ wf.T                       # exact integers
        if li == 0:
            corr = x_zp * wf.sum(axis=1)     # exact integers
            acc = np.float32(x_scale) * (acc - corr).astype(np.float32)
        q = np.clip(np.round(np.asarray(acc, dtype=np.float32)), 0.0, 255.0)
        # quantized ReLU with zero_point 0 after the clamp is a no-op
        h = np.asarray(q, dtype=np.float64)
    return np.asarray(q, dtype=np.float32)


if __name__ == "__main__":
    # Model config (matches FFNN_qint8(input_dim, hidden_dim, out_dim, num_hidden))
    batch = 8
    input_dim = 32
    hidden_dim = 32
    out_dim = 16
    num_hidden = 2

    key = jax.random.PRNGKey(0)
    k_x, *k_ws = jax.random.split(key, 2 + num_hidden + 1)

    # Deterministic qint8 weights (the torch module leaves weights uninitialized,
    # so we use synthetic int8 values); bias is forced to zeros by the module.
    dim_list = [input_dim] + [hidden_dim] * num_hidden + [out_dim]
    params = []
    for li, (din, dout) in enumerate(zip(dim_list[:-1], dim_list[1:])):
        w_int8 = jax.random.randint(k_ws[li], (dout, din), -8, 8, dtype=jnp.int32)
        b = jnp.zeros((dout,), dtype=jnp.float32)
        params.append((w_int8.astype(jnp.float32), b))

    # Build a quint8 input: quantize a float input with (x_scale, x_zp).
    x_scale, x_zp = 0.05, 128
    x_float = jax.random.normal(k_x, (batch, input_dim), dtype=jnp.float32)
    x_q = jnp.clip(jnp.round(x_float / x_scale) + x_zp, 0, 255).astype(jnp.float32)

    # One-time weight preparation (cached); per-call cost is just the jitted call.
    prepared, model_out_dim = prepare_ffnn_qint8_params(params)
    scale_zp = jnp.array([x_scale, float(x_zp)], dtype=jnp.float32)

    out = ffnn_qint8_forward(x_q, prepared, scale_zp, out_dim=model_out_dim)
    out = jax.block_until_ready(out)

    # Second call: reuses the cached weights and the compiled executable
    # (no retrace, no re-preprocessing) even if scale/zp change at runtime.
    out2 = ffnn_qint8_forward(x_q, prepared, scale_zp, out_dim=model_out_dim)
    out2 = jax.block_until_ready(out2)

    ref = _reference_forward_np(np.asarray(x_q), params, x_scale=x_scale, x_zp=x_zp)
    assert out.shape == (batch, model_out_dim)
    # Integer-exact math on both sides; allow 1 quantization step of slack for
    # any round-half boundary flip.
    assert float(jnp.max(jnp.abs(out.astype(jnp.float32) - jnp.asarray(ref)))) <= 1.0
    assert float(jnp.max(jnp.abs(out2.astype(jnp.float32) - jnp.asarray(ref)))) <= 1.0

    print("KERNEL_OK")
</pallas_src>

<mosaic_0001>
module attributes {stable_mosaic.version = 11 : i64} {
  func.func @_ffnn_kernel(%arg0: i32, %arg1: memref<2xf32, #tpu.memory_space<smem>>, %arg2: memref<8x32xbf16, #tpu.memory_space<vmem>>, %arg3: memref<32x32xbf16, #tpu.memory_space<vmem>>, %arg4: memref<32x32xbf16, #tpu.memory_space<vmem>>, %arg5: memref<32x128xbf16, #tpu.memory_space<vmem>>, %arg6: memref<1x32xf32, #tpu.memory_space<vmem>>, %arg7: memref<8x128xbf16, #tpu.memory_space<vmem>>) attributes {dimension_semantics = [#tpu.dimension_semantics<arbitrary>], iteration_bounds = array<i64: 1>, scalar_prefetch = 0 : i64, scratch_operands = 0 : i64, tpu.core_type = #tpu.core_type<tc>, window_params = [{transform_indices = @transform_0, window_bounds = array<i64: 2>}, {pipeline_mode = #tpu.pipeline_mode<synchronous>, transform_indices = @transform_1, window_bounds = array<i64: 8, 32>}, {pipeline_mode = #tpu.pipeline_mode<synchronous>, transform_indices = @transform_2, window_bounds = array<i64: 32, 32>}, {pipeline_mode = #tpu.pipeline_mode<synchronous>, transform_indices = @transform_3, window_bounds = array<i64: 32, 32>}, {pipeline_mode = #tpu.pipeline_mode<synchronous>, transform_indices = @transform_4, window_bounds = array<i64: 32, 128>}, {pipeline_mode = #tpu.pipeline_mode<synchronous>, transform_indices = @transform_5, window_bounds = array<i64: 1, 32>}, {pipeline_mode = #tpu.pipeline_mode<synchronous>, transform_indices = @transform_6, window_bounds = array<i64: 8, 128>}]} {
    %c0 = arith.constant 0 : index
    %0 = memref.load %arg1[%c0] : memref<2xf32, #tpu.memory_space<smem>>
    %c1 = arith.constant 1 : index
    %1 = memref.load %arg1[%c1] : memref<2xf32, #tpu.memory_space<smem>>
    %c0_0 = arith.constant 0 : index
    %c0_1 = arith.constant 0 : index
    %2 = vector.load %arg2[%c0_0, %c0_1] : memref<8x32xbf16, #tpu.memory_space<vmem>>, vector<8x32xbf16>
    %c0_2 = arith.constant 0 : index
    %c0_3 = arith.constant 0 : index
    %3 = vector.load %arg3[%c0_2, %c0_3] : memref<32x32xbf16, #tpu.memory_space<vmem>>, vector<32x32xbf16>
    %cst = arith.constant dense<0.000000e+00> : vector<8x32xf32>
    %4 = tpu.matmul %2, %3, %cst {dimension_numbers = #tpu.dot_dimension_numbers<[1], [0], [0], [1], [0, 0, 1, 1], [], []>} : vector<8x32xbf16>, vector<32x32xbf16>, vector<8x32xf32> -> vector<8x32xf32>
    %c0_4 = arith.constant 0 : index
    %c0_5 = arith.constant 0 : index
    %5 = vector.load %arg6[%c0_4, %c0_5] : memref<1x32xf32, #tpu.memory_space<vmem>>, vector<1x32xf32>
    %6 = vector.broadcast %1 : f32 to vector<1x32xf32>
    %7 = arith.mulf %6, %5 : vector<1x32xf32>
    %8 = vector.broadcast %7 : vector<1x32xf32> to vector<8x32xf32>
    %9 = arith.subf %4, %8 : vector<8x32xf32>
    %10 = vector.broadcast %0 : f32 to vector<8x32xf32>
    %11 = arith.mulf %10, %9 : vector<8x32xf32>
    %12 = math.roundeven %11 : vector<8x32xf32>
    %cst_6 = arith.constant 0.000000e+00 : f32
    %cst_7 = arith.constant 2.550000e+02 : f32
    %13 = vector.broadcast %cst_6 : f32 to vector<8x32xf32>
    %14 = arith.maximumf %13, %12 : vector<8x32xf32>
    %15 = vector.broadcast %cst_7 : f32 to vector<8x32xf32>
    %16 = arith.minimumf %15, %14 : vector<8x32xf32>
    %17 = arith.truncf %16 : vector<8x32xf32> to vector<8x32xbf16>
    %c0_8 = arith.constant 0 : index
    %c0_9 = arith.constant 0 : index
    %18 = vector.load %arg4[%c0_8, %c0_9] : memref<32x32xbf16, #tpu.memory_space<vmem>>, vector<32x32xbf16>
    %cst_10 = arith.constant dense<0.000000e+00> : vector<8x32xf32>
    %19 = tpu.matmul %17, %18, %cst_10 {dimension_numbers = #tpu.dot_dimension_numbers<[1], [0], [0], [1], [0, 0, 1, 1], [], []>} : vector<8x32xbf16>, vector<32x32xbf16>, vector<8x32xf32> -> vector<8x32xf32>
    %20 = math.roundeven %19 : vector<8x32xf32>
    %cst_11 = arith.constant 0.000000e+00 : f32
    %cst_12 = arith.constant 2.550000e+02 : f32
    %21 = vector.broadcast %cst_11 : f32 to vector<8x32xf32>
    %22 = arith.maximumf %21, %20 : vector<8x32xf32>
    %23 = vector.broadcast %cst_12 : f32 to vector<8x32xf32>
    %24 = arith.minimumf %23, %22 : vector<8x32xf32>
    %25 = arith.truncf %24 : vector<8x32xf32> to vector<8x32xbf16>
    %c0_13 = arith.constant 0 : index
    %c0_14 = arith.constant 0 : index
    %26 = vector.load %arg5[%c0_13, %c0_14] : memref<32x128xbf16, #tpu.memory_space<vmem>>, vector<32x128xbf16>
    %cst_15 = arith.constant dense<0.000000e+00> : vector<8x128xf32>
    %27 = tpu.matmul %25, %26, %cst_15 {dimension_numbers = #tpu.dot_dimension_numbers<[1], [0], [0], [1], [0, 0, 1, 1], [], []>} : vector<8x32xbf16>, vector<32x128xbf16>, vector<8x128xf32> -> vector<8x128xf32>
    %28 = math.roundeven %27 : vector<8x128xf32>
    %cst_16 = arith.constant 0.000000e+00 : f32
    %cst_17 = arith.constant 2.550000e+02 : f32
    %29 = vector.broadcast %cst_16 : f32 to vector<8x128xf32>
    %30 = arith.maximumf %29, %28 : vector<8x128xf32>
    %31 = vector.broadcast %cst_17 : f32 to vector<8x128xf32>
    %32 = arith.minimumf %31, %30 : vector<8x128xf32>
    %33 = arith.truncf %32 : vector<8x128xf32> to vector<8x128xbf16>
    %c0_18 = arith.constant 0 : index
    %c0_19 = arith.constant 0 : index
    %34 = vector.load %arg7[%c0_18, %c0_19] : memref<8x128xbf16, #tpu.memory_space<vmem>>, vector<8x128xbf16>
    tpu.vector_store %arg7[%c0_18, %c0_19], %33 {strides = array<i32>} : memref<8x128xbf16, #tpu.memory_space<vmem>>, vector<8x128xbf16>,
    return
  }
  func.func @transform_0(%arg0: i32) -> i32 {
    %c0_i32 = arith.constant 0 : i32
    %c0_i32_0 = arith.constant 0 : i32
    return %c0_i32 : i32
  }
  func.func @transform_1(%arg0: i32) -> (i32, i32) {
    %c0_i32 = arith.constant 0 : i32
    %c0_i32_0 = arith.constant 0 : i32
    %c0_i32_1 = arith.constant 0 : i32
    return %c0_i32, %c0_i32_0 : i32, i32
  }
  func.func @transform_2(%arg0: i32) -> (i32, i32) {
    %c0_i32 = arith.constant 0 : i32
    %c0_i32_0 = arith.constant 0 : i32
    %c0_i32_1 = arith.constant 0 : i32
    return %c0_i32, %c0_i32_0 : i32, i32
  }
  func.func @transform_3(%arg0: i32) -> (i32, i32) {
    %c0_i32 = arith.constant 0 : i32
    %c0_i32_0 = arith.constant 0 : i32
    %c0_i32_1 = arith.constant 0 : i32
    return %c0_i32, %c0_i32_0 : i32, i32
  }
  func.func @transform_4(%arg0: i32) -> (i32, i32) {
    %c0_i32 = arith.constant 0 : i32
    %c0_i32_0 = arith.constant 0 : i32
    %c0_i32_1 = arith.constant 0 : i32
    return %c0_i32, %c0_i32_0 : i32, i32
  }
  func.func @transform_5(%arg0: i32) -> (i32, i32) {
    %c0_i32 = arith.constant 0 : i32
    %c0_i32_0 = arith.constant 0 : i32
    %c0_i32_1 = arith.constant 0 : i32
    return %c0_i32, %c0_i32_0 : i32, i32
  }
  func.func @transform_6(%arg0: i32) -> (i32, i32) {
    %c0_i32 = arith.constant 0 : i32
    %c0_i32_0 = arith.constant 0 : i32
    %c0_i32_1 = arith.constant 0 : i32
    return %c0_i32, %c0_i32_0 : i32, i32
  }
}

</mosaic_0001>

<bundles_post_ra>
// kernel: ffnn_qint8_forward.1
= control target key start
LH: loop header
LB: loop body
LE: loop exit
PB: predicated region body
PF: predicated region fallthrough
CT: control target
= control target key end

     0   :  { %11 = vsyncpa [#allocation5], 0  ;;  %s532_s0 = inlined_call_operand.vmem [shape: f32[2], index: 0, kind: input, shape index: {}]   ;;  %s533_s1 = inlined_call_operand.vmem [shape: bf16[8,32], index: 1, kind: input, shape index: {}]   ;;  %s534_s2 = inlined_call_operand.vmem [shape: bf16[32,32], index: 2, kind: input, shape index: {}]   ;;  %s535_s3 = inlined_call_operand.hbm [shape: bf16[32,32], index: 3, kind: input, shape index: {}]   ;;  %s536_s4 = inlined_call_operand.hbm [shape: bf16[32,128], index: 4, kind: input, shape index: {}]   ;;  %s537_s5 = inlined_call_operand.vmem [shape: f32[1,32], index: 5, kind: input, shape index: {}]   ;;  %s538_s6 = inlined_call_operand.hbm [shape: bf16[8,128], index: 6, kind: output, shape index: {}]  }
   0x1   :  { %12 = vsyncpa [#allocation3], 0 }
   0x2   :  { %13 = vsyncpa [#allocation8], 0 }
   0x3   :  { %14 = vsyncpa [#allocation4], 0  ;;  %s21_s23 = sshll.u32 %s532_s0, 4  ;;  %s22_s23 = int_to_ptr.vmem [resolvable:$true] %s21_s23 }
   0x4   :  { %s349_s24 = scalar_lea.vmem %s22_s23, 16  ;;  %p354_p1 = scmp.lt.s32.totalorder %s22_s23, %s22_s23 }
   0x5   :  { %p350_p0 = scmp.ne.s32.totalorder %s22_s23, %s349_s24  ;;  %p355_p2 = scmp.lt.s32.totalorder %s349_s24, %s349_s24 }
   0x7   :  { %p356_p3 = por %p355_p2, %p354_p1 }
   0x9   :  { %p357_p4 = pnand %p356_p3, %p350_p0 }
   0xb   :  { %360 = shalt.err (!%p357_p4)
}
   0xc   :  { %s435_s25 = smov [#allocation2]   ;;  %s436_s26 = smov [#allocation6]  }
   0xd   :  { %24 = dma.vmem_to_smem %s22_s23, 16, %s435_s25, [#allocation5]  }
   0xe   :  { %s34_s27 = sshll.u32 %s436_s26, 4  ;;  %s361_s30 = scalar_lea.hbm %s535_s3, 256  ;;  %s35_s27 = int_to_ptr.vmem [resolvable:$true] %s34_s27 }
   0xf   :  { %p362_p5 = scmp.ne.s32.totalorder %s535_s3, %s361_s30  ;;  %p365_p6 = scmp.lt.u32.totalorder %s361_s30, %s535_s3 }
  0x11   :  { %p367_p7 = pnand %p365_p6, %p362_p5 }
  0x13   :  { %370 = shalt.err (!%p367_p7)
}
  0x14   :  { %s371_s10 = scalar_lea.vmem %s35_s27, 256  ;;  %p376_p9 = scmp.lt.s32.totalorder %s35_s27, %s35_s27 }
  0x15   :  { %p372_p8 = scmp.ne.s32.totalorder %s35_s27, %s371_s10  ;;  %p377_p10 = scmp.lt.s32.totalorder %s371_s10, %s371_s10 }
  0x17   :  { %p378_p11 = por %p377_p10, %p376_p9 }
  0x19   :  { %p379_p12 = pnand %p378_p11, %p372_p8 }
  0x1b   :  { %382 = shalt.err (!%p379_p12)
}
  0x1c   :  { %s437_s11 = smov 64   ;;  %s438_s12 = smov 4  }
  0x1d   :  { %40 = dma.hbm_to_vmem [thread:$0]  %s535_s3, 256, %s35_s27, [#allocation3], %s437_s11, %s437_s11, %s438_s12  }
  0x1e   :  { %s439_s15 = smov [#allocation7]   ;;  %s383_s19 = scalar_lea.hbm %s536_s4, 256 }
  0x1f   :  { %s46_s16 = sshll.u32 %s439_s15, 4  ;;  %p384_p13 = scmp.ne.s32.totalorder %s536_s4, %s383_s19  ;;  %s47_s16 = int_to_ptr.vmem [resolvable:$true] %s46_s16 }
  0x20   :  { %p387_p0 = scmp.lt.u32.totalorder %s383_s19, %s536_s4 }
  0x22   :  { %p389_p1 = pnand %p387_p0, %p384_p13 }
  0x24   :  { %392 = shalt.err (!%p389_p1)
}
  0x25   :  { %s393_s24 = scalar_lea.vmem %s47_s16, 256  ;;  %p398_p3 = scmp.lt.s32.totalorder %s47_s16, %s47_s16 }
  0x26   :  { %p394_p2 = scmp.ne.s32.totalorder %s47_s16, %s393_s24  ;;  %p399_p4 = scmp.lt.s32.totalorder %s393_s24, %s393_s24 }
  0x28   :  { %p400_p5 = por %p399_p4, %p398_p3 }
  0x2a   :  { %p401_p6 = pnand %p400_p5, %p394_p2 }
  0x2c   :  { %404 = shalt.err (!%p401_p6)
}
  0x2d   :  { %52 = dma.hbm_to_vmem [thread:$0]  %s536_s4, 256, %s47_s16, [#allocation8], %s437_s11, %s437_s11, %s438_s12  }
  0x2e   :  { %427 = dma.done.wait [#allocation5], 16  }
  0x2f   :  { %428 = vsyncadd [#allocation5], 4294967280 }
  0x30   :  { %429 = dma.done.wait [#allocation3], 256  }
  0x31   :  { %430 = vsyncadd [#allocation3], 4294967040 }
  0x32   :  { %431 = dma.done.wait [#allocation8], 256  }
  0x33   :  { %432 = vsyncadd [#allocation8], 4294967040 }
  0x34   :  { %64 = sfence }
  0x35   :  { %v343_v0 = vld [vmem:[%s534_s2] sm:$0xff]   ;;  %v440_v1 = vmov 0.0   ;;  %v344_v2 = vld [vmem:[%s534_s2 + $0x8] sm:$0xff]   ;;  %vm441_vm0 = vmmov 0   ;;  %vm85_vm1 = vcmask 261120   ;;  %v345_v4 = vld [vmem:[#allocation6] sm:$0xff]   ;;  %v133_v6 = vlaneseq }
  0x36   :  { %308 = vmatprep.subr.bf16.mxu0 %v440_v1  ;;  %316 = vmatprep.subr.bf16.mxu1 %v440_v1  ;;  %v68_v3 = vld [vmem:[%s533_s1] sm:$0xf]  ;;  %s289_s2 = sld [smem:[#allocation2 + $0x1]]  ;;  %s66_s0 = sld [smem:[#allocation2]]  ;;  %v347_v24 = vld [vmem:[#allocation7] sm:$0xff]   ;;  %v348_v25 = vld [vmem:[#allocation7 + $0x8] sm:$0xff]  }
  0x37   :  { %309 = vmatpush3.bf16.msra.mxu0 %v343_v0  ;;  %312 = vmatprep.mubr.msk.bf16.mxu0 %vm441_vm0, %v440_v1  ;;  %v346_v5 = vld [vmem:[#allocation6 + $0x8] sm:$0xff]   ;;  %v134_v7 = vshrl.u32 %v133_v6, 7  ;;  %s442_s1 = smov [#allocation9]  }
  0x38   :  { %310 = vmatprep.subr.bf16.mxu0 %v440_v1  ;;  %320 = vmatprep.mubr.msk.bf16.mxu1 %vm441_vm0, %v440_v1  ;;  %v129_v8 = vld [vmem:[%s537_s5] sm:$0x1]  ;;  %s278_s5 = sshll.u32 %s442_s1, 4  ;;  %s279_s5 = int_to_ptr.vmem [resolvable:$true] %s278_s5 }
  0x39   :  { %317 = vmatpush3.bf16.msra.mxu1 %v345_v4  ;;  %v135_v11 = vsub.s32 0, %v134_v7  ;;  %s405_s9 = scalar_lea.vmem %s279_s5, 64  ;;  %p410_p8 = scmp.lt.s32.totalorder %s279_s5, %s279_s5 }
  0x3a   :  { %318 = vmatprep.subr.bf16.mxu1 %v440_v1  ;;  %p406_p7 = scmp.ne.s32.totalorder %s279_s5, %s405_s9  ;;  %p411_p9 = scmp.lt.s32.totalorder %s405_s9, %s405_s9 }
  0x3b   :  { %311 = vmatpush3.bf16.msra.mxu0 %v344_v2 }
  0x3c   :  { %324 = vmatprep.subr.bf16.mxu0 %v440_v1  ;;  %v130_v9 = vstv %s289_s2  ;;  %v139_v14 = vstv %s66_s0  ;;  %p412_p10 = por %p411_p9, %p410_p8 }
  0x3d   :  { %319 = vmatpush3.bf16.msra.mxu1 %v346_v5  ;;  %v131_v10 = vmul.f32 %v130_v9, %v129_v8 }
  0x3e   :  { %313 = vmatmul.mubr.msk.bf16.vlgmr.msra.gmra.mrb[0].mxu0 %vm85_vm1, %v68_v3  ;;  %p413_p11 = pnand %p412_p10, %p406_p7 }
  0x3f   :  { %328 = vmatprep.mubr.msk.bf16.mxu0 %vm441_vm0, %v440_v1  ;;  %v136_v12 = vrot.slane %v131_v10, %v135_v11  ;;  %325 = vmatpush3.bf16.msra.mxu0 %v347_v24 }
  0x40   :  { %326 = vmatprep.subr.bf16.mxu0 %v440_v1 }
  0x43   :  { %327 = vmatpush3.bf16.msra.mxu0 %v348_v25 }
 0x111   :  { %v123_v13 = vpop.f32.mrb[0].mxu0 }
 0x112   :  { %v138_v15 = vsub.f32 %v123_v13, %v136_v12  ;;  %v314_v16 = vpop.f32.mrb[1].mxu0 }
 0x113   :  { %v126_v17 = vpop.f32.mrb[2].mxu0 }
 0x114   :  { %v140_v18 = vmul.f32 %v139_v14, %v138_v15  ;;  %v315_v19 = vpop.f32.mrb[3].mxu0 }
 0x116   :  { %v332_v20 = vround.rtne.f32 %v140_v18 }
 0x118   :  { %v142_v21 = vmax.f32 %v332_v20, 0.0 }
 0x11a   :  { %v143_v22 = vmin.f32 %v142_v21, 255.0 }
 0x11c   :  { %v144_v23 = vpack.c.bf16 %v143_v22, %v143_v22 }
 0x11e   :  { %321 = vmatmul.mubr.msk.bf16.vlgmr.msra.gmra.mrb[0].mxu1 %vm85_vm1, %v144_v23 }
 0x1f1   :  { %v198_v26 = vpop.f32.mrb[0].mxu1 }
 0x1f2   :  { %v333_v27 = vround.rtne.f32 %v198_v26  ;;  %v322_v28 = vpop.f32.mrb[1].mxu1 }
 0x1f3   :  { %v201_v29 = vpop.f32.mrb[2].mxu1 }
 0x1f4   :  { %v205_v30 = vmax.f32 %v333_v27, 0.0  ;;  %v323_v31 = vpop.f32.mrb[3].mxu1 }
 0x1f6   :  { %v206_v32 = vmin.f32 %v205_v30, 255.0 }
 0x1f8   :  { %v207_v33 = vpack.c.bf16 %v206_v32, %v206_v32 }
 0x1fa   :  { %329 = vmatmul.mubr.msk.bf16.vlgmr.msra.gmra.mrb[4].mxu0 %vm85_vm1, %v207_v33 }
 0x2cd   :  { %v261_v34 = vpop.f32.mrb[4].mxu0 }
 0x2ce   :  { %v334_v35 = vround.rtne.f32 %v261_v34  ;;  %v330_v36 = vpop.f32.mrb[5].mxu0 }
 0x2cf   :  { %v264_v37 = vpop.f32.mrb[6].mxu0 }
 0x2d0   :  { %v268_v38 = vmax.f32 %v334_v35, 0.0  ;;  %v331_v39 = vpop.f32.mrb[7].mxu0 }
 0x2d2   :  { %v269_v40 = vmin.f32 %v268_v38, 255.0 }
 0x2d4   :  { %v270_v41 = vpack.c.bf16 %v269_v40, %v269_v40 }
 0x2d6   :  { %271 = vst [vmem:[#allocation9] sm:$0xf] %v270_v41 }
 0x2d7   :  { %416 = shalt.err (!%p413_p11)
}
 0x2d8   :  { %s417_s12 = scalar_lea.hbm %s538_s6, 64 }
 0x2d9   :  { %p418_p12 = scmp.ne.s32.totalorder %s538_s6, %s417_s12  ;;  %p421_p13 = scmp.lt.u32.totalorder %s417_s12, %s538_s6 }
 0x2db   :  { %p423_p0 = pnand %p421_p13, %p418_p12 }
 0x2dd   :  { %426 = shalt.err (!%p423_p0)
}
 0x2de   :  { %281 = dma.vmem_to_hbm [thread:$0]  %s279_s5, 64, %s538_s6, [#allocation4]  }
 0x2df   :  { %433 = dma.done.wait [#allocation4], 64  }
 0x2e0   :  { %434 = vsyncadd [#allocation4], 4294967232 }
 0x2e1   :  { %285 = vsyncpa [#allocation3], 1 }
 0x2e2   :  { %286 = vsyncpa [#allocation8], 1 }
 0x2e3   :  { %287 = vsyncpa [#allocation4], 1 }
 0x2e4   :  { %288 = vsyncpa [#allocation5], 1 }

</bundles_post_ra>
